<compile_context>
chip_gen: v7x
topology: tpu7x:2x2x1
jax: 0.10.0
libtpu: 0.0.40
codegen_flags: <defaults>
</compile_context>

<pallas_src>
import jax
import jax.numpy as jnp
from jax.experimental import pallas as pl
from jax.experimental.pallas import tpu as pltpu

_LANE = 128
_SUBLANE = 8


def _round_up(n, m):
    return ((n + m - 1) // m) * m


def _adv_kernel(x_ref, w1_ref, b1_ref, w2_ref, b2_ref, w3_ref, b3_ref, o_ref):
    x = x_ref[...]                                   # (TB, F_p) compute dtype (bf16)

    # ad_layer1 + ReLU   (dropout1: identity in eval mode)
    h1 = jnp.dot(x, w1_ref[...], preferred_element_type=jnp.float32) + b1_ref[...]
    h1 = jnp.maximum(h1, 0.0)
    # TODO(synk): dropout(p=0.5) is training-time stochastic masking; omitted (eval semantics).

    # ad_layer2 + ReLU   (dropout2: identity in eval mode)
    h1 = h1.astype(w2_ref.dtype)                     # bf16 MXU operand, f32 accumulate
    h2 = jnp.dot(h1, w2_ref[...], preferred_element_type=jnp.float32) + b2_ref[...]
    h2 = jnp.maximum(h2, 0.0)

    # ad_layer3 (out width 1): VPU multiply + lane reduce instead of a 1-wide MXU matmul.
    logits = jnp.sum(h2 * w3_ref[...], axis=-1, keepdims=True) + b3_ref[0, 0]  # (TB, 1) f32

    # Sigmoid: exp on EUP, reciprocal on EUP (approx) -> epilogue off the VPU divide path.
    sig = pl.reciprocal(1.0 + jnp.exp(-logits), approx=True)                   # (TB, 1)

    # Lane-dense store: broadcast across the 128-lane axis; host slices column 0.
    o_ref[...] = jnp.broadcast_to(sig, o_ref.shape).astype(o_ref.dtype)


def sc_adversarial_forward(x, params, *, block_b=128, compute_dtype=jnp.bfloat16):
    """Fused 3-layer MLP + sigmoid (forward / eval semantics).

    x: (B, in_feature) float32
    params: dict with w1 (F,H), b1 (1,H), w2 (H,H), b2 (1,H), w3 (H,1), b3 (1,1)
    returns: (B, 1) float32 in [0, 1]
    """
    B, F = x.shape
    H = params["w1"].shape[1]

    # Padded, MXU/lane-aligned shapes (zero padding does not change the math).
    F_p = _round_up(F, _LANE)
    H_p = _round_up(H, _LANE)
    TB = min(_round_up(B, _SUBLANE), _round_up(block_b, _SUBLANE))
    B_p = _round_up(B, TB)

    # Host-side prep: pad + cast matmul operands to bf16; keep biases / w3 row in f32.
    x_p = jnp.pad(x, ((0, B_p - B), (0, F_p - F))).astype(compute_dtype)
    w1 = jnp.pad(params["w1"], ((0, F_p - F), (0, H_p - H))).astype(compute_dtype)
    b1 = jnp.pad(params["b1"], ((0, 0), (0, H_p - H))).astype(jnp.float32)
    w2 = jnp.pad(params["w2"], ((0, H_p - H), (0, H_p - H))).astype(compute_dtype)
    b2 = jnp.pad(params["b2"], ((0, 0), (0, H_p - H))).astype(jnp.float32)
    w3_row = jnp.pad(params["w3"].T, ((0, 0), (0, H_p - H))).astype(jnp.float32)  # (1, H_p)
    b3 = params["b3"].astype(jnp.float32)                                          # (1, 1)

    # VMEM budget estimate (double-buffered x/out tiles + resident weights + live h1/h2).
    it = jnp.dtype(compute_dtype).itemsize
    est = (2 * TB * F_p * it + 2 * TB * _LANE * 4
           + (F_p + H_p) * H_p * it + 3 * H_p * 4 + 2 * TB * H_p * 4)
    vmem_limit = int(min(max(2 * est + (4 << 20), 16 << 20), 48 << 20))

    grid = (B_p // TB,)
    out = pl.pallas_call(
        _adv_kernel,
        out_shape=jax.ShapeDtypeStruct((B_p, _LANE), jnp.float32),
        grid=grid,
        in_specs=[
            pl.BlockSpec((TB, F_p), lambda i: (i, 0)),      # x tile streams
            pl.BlockSpec((F_p, H_p), lambda i: (0, 0)),     # w1 resident
            pl.BlockSpec((1, H_p), lambda i: (0, 0)),       # b1 resident
            pl.BlockSpec((H_p, H_p), lambda i: (0, 0)),     # w2 resident
            pl.BlockSpec((1, H_p), lambda i: (0, 0)),       # b2 resident
            pl.BlockSpec((1, H_p), lambda i: (0, 0)),       # w3 row resident
            pl.BlockSpec(memory_space=pltpu.MemorySpace.SMEM),  # b3 scalar
        ],
        out_specs=pl.BlockSpec((TB, _LANE), lambda i: (i, 0)),
        compiler_params=pltpu.CompilerParams(
            dimension_semantics=("parallel",),
            vmem_limit_bytes=vmem_limit,
        ),
    )(x_p, w1, b1, w2, b2, w3_row, b3)

    return out[:B, :1]


def init_params(key, in_feature, hidden_size):
    """Deterministic init mirroring the PyTorch module:
       Linear weights ~ xavier_normal_, biases = 0.
       Weights stored transposed as (in, out) since the kernel computes x @ W."""
    k1, k2, k3 = jax.random.split(key, 3)

    def xavier_normal(k, fan_in, fan_out):
        std = jnp.sqrt(2.0 / (fan_in + fan_out))
        return (std * jax.random.normal(k, (fan_in, fan_out))).astype(jnp.float32)

    return {
        "w1": xavier_normal(k1, in_feature, hidden_size),
        "b1": jnp.zeros((1, hidden_size), jnp.float32),
        "w2": xavier_normal(k2, hidden_size, hidden_size),
        "b2": jnp.zeros((1, hidden_size), jnp.float32),
        "w3": xavier_normal(k3, hidden_size, 1),
        "b3": jnp.zeros((1, 1), jnp.float32),
    }


if __name__ == "__main__":
    in_feature, hidden_size, batch = 32, 32, 8

    key = jax.random.PRNGKey(0)
    kx, kp = jax.random.split(key)
    x = jax.random.normal(kx, (batch, in_feature), dtype=jnp.float32)
    params = init_params(kp, in_feature, hidden_size)

    y = sc_adversarial_forward(x, params)
    y = jax.block_until_ready(y)

    # Reference in plain JAX (same bf16-operand / f32-accumulate recipe).
    cd = jnp.bfloat16
    h1 = jnp.dot(x.astype(cd), params["w1"].astype(cd),
                 preferred_element_type=jnp.float32) + params["b1"]
    h1 = jnp.maximum(h1, 0.0)
    h2 = jnp.dot(h1.astype(cd), params["w2"].astype(cd),
                 preferred_element_type=jnp.float32) + params["b2"]
    h2 = jnp.maximum(h2, 0.0)
    ref = jax.nn.sigmoid(h2 @ params["w3"] + params["b3"])

    assert y.shape == (batch, 1)
    assert jnp.all(jnp.isfinite(y))
    assert jnp.allclose(y, ref, atol=2e-2, rtol=2e-2), (
        f"max abs err {float(jnp.max(jnp.abs(y - ref)))}")

    print("KERNEL_OK")
</pallas_src>

<mosaic_0001>
module attributes {stable_mosaic.version = 11 : i64} {
  func.func @_adv_kernel(%arg0: i32, %arg1: memref<8x128xbf16, #tpu.memory_space<vmem>>, %arg2: memref<128x128xbf16, #tpu.memory_space<vmem>>, %arg3: memref<1x128xf32, #tpu.memory_space<vmem>>, %arg4: memref<128x128xbf16, #tpu.memory_space<vmem>>, %arg5: memref<1x128xf32, #tpu.memory_space<vmem>>, %arg6: memref<1x128xf32, #tpu.memory_space<vmem>>, %arg7: memref<1x1xf32, #tpu.memory_space<smem>>, %arg8: memref<8x128xf32, #tpu.memory_space<vmem>>) attributes {dimension_semantics = [#tpu.dimension_semantics<parallel>], iteration_bounds = array<i64: 1>, scalar_prefetch = 0 : i64, scratch_operands = 0 : i64, tpu.core_type = #tpu.core_type<tc>, window_params = [{transform_indices = @transform_0, window_bounds = array<i64: 8, 128>}, {pipeline_mode = #tpu.pipeline_mode<synchronous>, transform_indices = @transform_1, window_bounds = array<i64: 128, 128>}, {pipeline_mode = #tpu.pipeline_mode<synchronous>, transform_indices = @transform_2, window_bounds = array<i64: 1, 128>}, {pipeline_mode = #tpu.pipeline_mode<synchronous>, transform_indices = @transform_3, window_bounds = array<i64: 128, 128>}, {pipeline_mode = #tpu.pipeline_mode<synchronous>, transform_indices = @transform_4, window_bounds = array<i64: 1, 128>}, {pipeline_mode = #tpu.pipeline_mode<synchronous>, transform_indices = @transform_5, window_bounds = array<i64: 1, 128>}, {transform_indices = @transform_6, window_bounds = array<i64: 1, 1>}, {transform_indices = @transform_7, window_bounds = array<i64: 8, 128>}]} {
    %c0 = arith.constant 0 : index
    %c0_0 = arith.constant 0 : index
    %0 = vector.load %arg1[%c0, %c0_0] : memref<8x128xbf16, #tpu.memory_space<vmem>>, vector<8x128xbf16>
    %c0_1 = arith.constant 0 : index
    %c0_2 = arith.constant 0 : index
    %1 = vector.load %arg2[%c0_1, %c0_2] : memref<128x128xbf16, #tpu.memory_space<vmem>>, vector<128x128xbf16>
    %cst = arith.constant dense<0.000000e+00> : vector<8x128xf32>
    %2 = tpu.matmul %0, %1, %cst {dimension_numbers = #tpu.dot_dimension_numbers<[1], [0], [0], [1], [0, 0, 1, 1], [], []>} : vector<8x128xbf16>, vector<128x128xbf16>, vector<8x128xf32> -> vector<8x128xf32>
    %c0_3 = arith.constant 0 : index
    %c0_4 = arith.constant 0 : index
    %3 = vector.load %arg3[%c0_3, %c0_4] : memref<1x128xf32, #tpu.memory_space<vmem>>, vector<1x128xf32>
    %4 = vector.broadcast %3 : vector<1x128xf32> to vector<8x128xf32>
    %5 = arith.addf %2, %4 : vector<8x128xf32>
    %cst_5 = arith.constant 0.000000e+00 : f32
    %6 = vector.broadcast %cst_5 : f32 to vector<8x128xf32>
    %7 = arith.maximumf %5, %6 : vector<8x128xf32>
    %8 = arith.truncf %7 : vector<8x128xf32> to vector<8x128xbf16>
    %c0_6 = arith.constant 0 : index
    %c0_7 = arith.constant 0 : index
    %9 = vector.load %arg4[%c0_6, %c0_7] : memref<128x128xbf16, #tpu.memory_space<vmem>>, vector<128x128xbf16>
    %cst_8 = arith.constant dense<0.000000e+00> : vector<8x128xf32>
    %10 = tpu.matmul %8, %9, %cst_8 {dimension_numbers = #tpu.dot_dimension_numbers<[1], [0], [0], [1], [0, 0, 1, 1], [], []>} : vector<8x128xbf16>, vector<128x128xbf16>, vector<8x128xf32> -> vector<8x128xf32>
    %c0_9 = arith.constant 0 : index
    %c0_10 = arith.constant 0 : index
    %11 = vector.load %arg5[%c0_9, %c0_10] : memref<1x128xf32, #tpu.memory_space<vmem>>, vector<1x128xf32>
    %12 = vector.broadcast %11 : vector<1x128xf32> to vector<8x128xf32>
    %13 = arith.addf %10, %12 : vector<8x128xf32>
    %cst_11 = arith.constant 0.000000e+00 : f32
    %14 = vector.broadcast %cst_11 : f32 to vector<8x128xf32>
    %15 = arith.maximumf %13, %14 : vector<8x128xf32>
    %c0_12 = arith.constant 0 : index
    %c0_13 = arith.constant 0 : index
    %16 = vector.load %arg6[%c0_12, %c0_13] : memref<1x128xf32, #tpu.memory_space<vmem>>, vector<1x128xf32>
    %17 = vector.broadcast %16 : vector<1x128xf32> to vector<8x128xf32>
    %18 = arith.mulf %15, %17 : vector<8x128xf32>
    %cst_14 = arith.constant dense<0.000000e+00> : vector<8xf32>
    %19 = vector.multi_reduction <add>, %18, %cst_14 [1] : vector<8x128xf32> to vector<8xf32>
    %20 = vector.shape_cast %19 : vector<8xf32> to vector<8x1xf32>
    %c0_15 = arith.constant 0 : index
    %c0_16 = arith.constant 0 : index
    %21 = memref.load %arg7[%c0_15, %c0_16] : memref<1x1xf32, #tpu.memory_space<smem>>
    %22 = vector.broadcast %21 : f32 to vector<8x1xf32>
    %23 = arith.addf %20, %22 : vector<8x1xf32>
    %cst_17 = arith.constant 0.000000e+00 : f32
    %24 = vector.broadcast %cst_17 : f32 to vector<8x1xf32>
    %25 = arith.subf %24, %23 : vector<8x1xf32>
    %26 = math.exp %25 : vector<8x1xf32>
    %cst_18 = arith.constant 1.000000e+00 : f32
    %27 = vector.broadcast %cst_18 : f32 to vector<8x1xf32>
    %28 = arith.addf %27, %26 : vector<8x1xf32>
    %29 = tpu.reciprocal %28 {approx = true} : vector<8x1xf32> -> vector<8x1xf32>
    %30 = vector.shape_cast %29 : vector<8x1xf32> to vector<8x1xf32>
    %31 = vector.broadcast %30 : vector<8x1xf32> to vector<8x128xf32>
    %c0_19 = arith.constant 0 : index
    %c0_20 = arith.constant 0 : index
    %32 = vector.load %arg8[%c0_19, %c0_20] : memref<8x128xf32, #tpu.memory_space<vmem>>, vector<8x128xf32>
    tpu.vector_store %arg8[%c0_19, %c0_20], %31 {strides = array<i32>} : memref<8x128xf32, #tpu.memory_space<vmem>>, vector<8x128xf32>,
    return
  }
  func.func @transform_0(%arg0: i32) -> (i32, i32) {
    %c0_i32 = arith.constant 0 : i32
    %c0_i32_0 = arith.constant 0 : i32
    return %arg0, %c0_i32 : i32, i32
  }
  func.func @transform_1(%arg0: i32) -> (i32, i32) {
    %c0_i32 = arith.constant 0 : i32
    %c0_i32_0 = arith.constant 0 : i32
    %c0_i32_1 = arith.constant 0 : i32
    return %c0_i32, %c0_i32_0 : i32, i32
  }
  func.func @transform_2(%arg0: i32) -> (i32, i32) {
    %c0_i32 = arith.constant 0 : i32
    %c0_i32_0 = arith.constant 0 : i32
    %c0_i32_1 = arith.constant 0 : i32
    return %c0_i32, %c0_i32_0 : i32, i32
  }
  func.func @transform_3(%arg0: i32) -> (i32, i32) {
    %c0_i32 = arith.constant 0 : i32
    %c0_i32_0 = arith.constant 0 : i32
    %c0_i32_1 = arith.constant 0 : i32
    return %c0_i32, %c0_i32_0 : i32, i32
  }
  func.func @transform_4(%arg0: i32) -> (i32, i32) {
    %c0_i32 = arith.constant 0 : i32
    %c0_i32_0 = arith.constant 0 : i32
    %c0_i32_1 = arith.constant 0 : i32
    return %c0_i32, %c0_i32_0 : i32, i32
  }
  func.func @transform_5(%arg0: i32) -> (i32, i32) {
    %c0_i32 = arith.constant 0 : i32
    %c0_i32_0 = arith.constant 0 : i32
    %c0_i32_1 = arith.constant 0 : i32
    return %c0_i32, %c0_i32_0 : i32, i32
  }
  func.func @transform_6(%arg0: i32) -> (i32, i32) {
    %c0_i32 = arith.constant 0 : i32
    %c0_i32_0 = arith.constant 0 : i32
    %c0_i32_1 = arith.constant 0 : i32
    return %c0_i32, %c0_i32_0 : i32, i32
  }
  func.func @transform_7(%arg0: i32) -> (i32, i32) {
    %c0_i32 = arith.constant 0 : i32
    %c0_i32_0 = arith.constant 0 : i32
    return %arg0, %c0_i32 : i32, i32
  }
}

</mosaic_0001>

<bundles_post_ra>
// kernel: tpu_custom_call.1
= control target key start
LH: loop header
LB: loop body
LE: loop exit
PB: predicated region body
PF: predicated region fallthrough
CT: control target
= control target key end

     0   :  { %13 = vsyncpa [#allocation4], 0  ;;  %s642_s0 = inlined_call_operand.hbm [shape: bf16[8,128], index: 0, kind: input, shape index: {}]   ;;  %s643_s1 = inlined_call_operand.hbm [shape: bf16[128,128], index: 1, kind: input, shape index: {}]   ;;  %s644_s2 = inlined_call_operand.vmem [shape: f32[1,128], index: 2, kind: input, shape index: {}]   ;;  %s645_s3 = inlined_call_operand.hbm [shape: bf16[128,128], index: 3, kind: input, shape index: {}]   ;;  %s646_s4 = inlined_call_operand.vmem [shape: f32[1,128], index: 4, kind: input, shape index: {}]   ;;  %s647_s5 = inlined_call_operand.vmem [shape: f32[1,128], index: 5, kind: input, shape index: {}]   ;;  %s648_s6 = inlined_call_operand.<no memory space> [shape: f32[1,1], index: 6, kind: input, shape index: {}]   ;;  %s649_s7 = inlined_call_operand.hbm [shape: f32[8,128], index: 7, kind: output, shape index: {}]  }
   0x1   :  { %14 = vsyncpa [#allocation7], 0 }
   0x2   :  { %15 = vsyncpa [#allocation5], 0  ;;  %s528_s24 = smov [#allocation6]   ;;  %s434_s28 = scalar_lea.hbm %s643_s1, 1024 }
   0x3   :  { %s31_s25 = sshll.u32 %s528_s24, 4  ;;  %p435_p0 = scmp.ne.s32.totalorder %s643_s1, %s434_s28  ;;  %s32_s25 = int_to_ptr.vmem [resolvable:$true] %s31_s25 }
   0x4   :  { %p438_p1 = scmp.lt.u32.totalorder %s434_s28, %s643_s1 }
   0x6   :  { %p440_p2 = pnand %p438_p1, %p435_p0 }
   0x8   :  { %443 = shalt.err (!%p440_p2)
}
   0x9   :  { %s444_s10 = scalar_lea.vmem %s32_s25, 1024  ;;  %p449_p4 = scmp.lt.s32.totalorder %s32_s25, %s32_s25 }
   0xa   :  { %p445_p3 = scmp.ne.s32.totalorder %s32_s25, %s444_s10  ;;  %p450_p5 = scmp.lt.s32.totalorder %s444_s10, %s444_s10 }
   0xc   :  { %p451_p6 = por %p450_p5, %p449_p4 }
   0xe   :  { %p452_p7 = pnand %p451_p6, %p445_p3 }
  0x10   :  { %455 = shalt.err (!%p452_p7)
}
  0x11   :  { %s529_s11 = smov 64   ;;  %s530_s12 = smov 4  }
  0x12   :  { %37 = dma.hbm_to_vmem [thread:$0]  %s643_s1, 1024, %s32_s25, [#allocation7], %s529_s11, %s529_s11, %s530_s12  }
  0x13   :  { %s531_s15 = smov [#allocation3]   ;;  %s532_s17 = smov [#allocation8]  }
  0x14   :  { %s22_s16 = sshll.u32 %s531_s15, 4  ;;  %s45_s18 = sshll.u32 %s532_s17, 4  ;;  %s23_s16 = int_to_ptr.vmem [resolvable:$true] %s22_s16  ;;  %s46_s18 = int_to_ptr.vmem [resolvable:$true] %s45_s18 }
  0x15   :  { %s456_s21 = scalar_lea.hbm %s642_s0, 64 }
  0x16   :  { %p457_p8 = scmp.ne.s32.totalorder %s642_s0, %s456_s21  ;;  %p460_p9 = scmp.lt.u32.totalorder %s456_s21, %s642_s0 }
  0x18   :  { %p462_p10 = pnand %p460_p9, %p457_p8 }
  0x1a   :  { %465 = shalt.err (!%p462_p10)
}
  0x1b   :  { %s466_s1 = scalar_lea.vmem %s23_s16, 64  ;;  %p471_p12 = scmp.lt.s32.totalorder %s23_s16, %s23_s16 }
  0x1c   :  { %p467_p11 = scmp.ne.s32.totalorder %s23_s16, %s466_s1  ;;  %p472_p13 = scmp.lt.s32.totalorder %s466_s1, %s466_s1 }
  0x1e   :  { %p473_p0 = por %p472_p13, %p471_p12 }
  0x20   :  { %p474_p1 = pnand %p473_p0, %p467_p11 }
  0x22   :  { %477 = shalt.err (!%p474_p1)
}
  0x23   :  { %25 = dma.hbm_to_vmem [thread:$0]  %s642_s0, 64, %s23_s16, [#allocation4]  }
  0x24   :  { %s478_s30 = scalar_lea.hbm %s645_s3, 1024 }
  0x25   :  { %p479_p2 = scmp.ne.s32.totalorder %s645_s3, %s478_s30  ;;  %p482_p3 = scmp.lt.u32.totalorder %s478_s30, %s645_s3 }
  0x27   :  { %p484_p4 = pnand %p482_p3, %p479_p2 }
  0x29   :  { %487 = shalt.err (!%p484_p4)
}
  0x2a   :  { %s488_s14 = scalar_lea.vmem %s46_s18, 1024  ;;  %p493_p6 = scmp.lt.s32.totalorder %s46_s18, %s46_s18 }
  0x2b   :  { %p489_p5 = scmp.ne.s32.totalorder %s46_s18, %s488_s14  ;;  %p494_p7 = scmp.lt.s32.totalorder %s488_s14, %s488_s14 }
  0x2d   :  { %p495_p8 = por %p494_p7, %p493_p6 }
  0x2f   :  { %p496_p9 = pnand %p495_p8, %p489_p5 }
  0x31   :  { %499 = shalt.err (!%p496_p9)
}
  0x32   :  { %51 = dma.hbm_to_vmem [thread:$0]  %s645_s3, 1024, %s46_s18, [#allocation7], %s529_s11, %s529_s11, %s530_s12  }
  0x33   :  { %522 = dma.done.wait [#allocation4], 64  }
  0x34   :  { %523 = vsyncadd [#allocation4], 4294967232 }
  0x35   :  { %524 = dma.done.wait [#allocation7], 2048  }
  0x36   :  { %525 = vsyncadd [#allocation7], 4294965248  ;;  %v533_v0 = vmov 0.0   ;;  %vm534_vm0 = vmmov 0   ;;  %v414_v1 = vld [vmem:[#allocation6] sm:$0xff]   ;;  %v415_v2 = vld [vmem:[#allocation6 + $0x8] sm:$0xff]   ;;  %v305_v35 = vstv %s648_s6 }
  0x37   :  { %366 = vmatprep.subr.bf16.mxu0 %v533_v0  ;;  %382 = vmatprep.mubr.msk.bf16.mxu0 %vm534_vm0, %v533_v0  ;;  %v416_v3 = vld [vmem:[#allocation6 + $0x10] sm:$0xff]   ;;  %v422_v4 = vld [vmem:[#allocation8] sm:$0xff]   ;;  %v417_v5 = vld [vmem:[#allocation6 + $0x18] sm:$0xff]  }
  0x38   :  { %386 = vmatprep.subr.bf16.mxu1 %v533_v0  ;;  %402 = vmatprep.mubr.msk.bf16.mxu1 %vm534_vm0, %v533_v0  ;;  %v423_v6 = vld [vmem:[#allocation8 + $0x8] sm:$0xff]   ;;  %v418_v7 = vld [vmem:[#allocation6 + $0x20] sm:$0xff]   ;;  %v424_v8 = vld [vmem:[#allocation8 + $0x10] sm:$0xff]  }
  0x39   :  { %367 = vmatpush3.bf16.msra.mxu0 %v414_v1  ;;  %387 = vmatpush3.bf16.msra.mxu1 %v422_v4  ;;  %v419_v9 = vld [vmem:[#allocation6 + $0x28] sm:$0xff]   ;;  %v425_v10 = vld [vmem:[#allocation8 + $0x18] sm:$0xff]   ;;  %v420_v11 = vld [vmem:[#allocation6 + $0x30] sm:$0xff]  }
  0x3a   :  { %368 = vmatprep.subr.bf16.mxu0 %v533_v0  ;;  %388 = vmatprep.subr.bf16.mxu1 %v533_v0  ;;  %v426_v12 = vld [vmem:[#allocation8 + $0x20] sm:$0xff]   ;;  %v421_v13 = vld [vmem:[#allocation6 + $0x38] sm:$0xff]   ;;  %v427_v14 = vld [vmem:[#allocation8 + $0x28] sm:$0xff]  }
  0x3b   :  { %v68_v15 = vld [vmem:[#allocation3] sm:$0xf]  ;;  %v428_v16 = vld [vmem:[#allocation8 + $0x30] sm:$0xff]  }
  0x3c   :  { %v429_v17 = vld [vmem:[#allocation8 + $0x38] sm:$0xff]  }
  0x3d   :  { %369 = vmatpush3.bf16.msra.mxu0 %v415_v2  ;;  %389 = vmatpush3.bf16.msra.mxu1 %v423_v6  ;;  %v329_v18 = vld [vmem:[%s644_s2] ss:$0 sm:$0xff] }
  0x3e   :  { %370 = vmatprep.subr.bf16.mxu0 %v533_v0  ;;  %390 = vmatprep.subr.bf16.mxu1 %v533_v0  ;;  %v338_v26 = vld [vmem:[%s646_s4] ss:$0 sm:$0xff]  ;;  %s535_s4 = smov [#allocation9]  }
  0x3f   :  { %v347_v31 = vld [vmem:[%s647_s5] ss:$0 sm:$0xff]  ;;  %s319_s20 = sshll.u32 %s535_s4, 4  ;;  %s320_s20 = int_to_ptr.vmem [resolvable:$true] %s319_s20 }
  0x40   :  { %s500_s5 = scalar_lea.vmem %s320_s20, 128  ;;  %p505_p11 = scmp.lt.s32.totalorder %s320_s20, %s320_s20 }
  0x41   :  { %371 = vmatpush3.bf16.msra.mxu0 %v416_v3  ;;  %391 = vmatpush3.bf16.msra.mxu1 %v424_v8  ;;  %p501_p10 = scmp.ne.s32.totalorder %s320_s20, %s500_s5  ;;  %p506_p12 = scmp.lt.s32.totalorder %s500_s5, %s500_s5 }
  0x42   :  { %372 = vmatprep.subr.bf16.mxu0 %v533_v0  ;;  %392 = vmatprep.subr.bf16.mxu1 %v533_v0 }
  0x43   :  { %p507_p13 = por %p506_p12, %p505_p11 }
  0x45   :  { %373 = vmatpush3.bf16.msra.mxu0 %v417_v5  ;;  %393 = vmatpush3.bf16.msra.mxu1 %v425_v10  ;;  %p508_p0 = pnand %p507_p13, %p501_p10 }
  0x46   :  { %374 = vmatprep.subr.bf16.mxu0 %v533_v0  ;;  %394 = vmatprep.subr.bf16.mxu1 %v533_v0 }
  0x49   :  { %375 = vmatpush3.bf16.msra.mxu0 %v418_v7  ;;  %395 = vmatpush3.bf16.msra.mxu1 %v426_v12 }
  0x4a   :  { %376 = vmatprep.subr.bf16.mxu0 %v533_v0  ;;  %396 = vmatprep.subr.bf16.mxu1 %v533_v0 }
  0x4d   :  { %377 = vmatpush3.bf16.msra.mxu0 %v419_v9  ;;  %397 = vmatpush3.bf16.msra.mxu1 %v427_v14 }
  0x4e   :  { %378 = vmatprep.subr.bf16.mxu0 %v533_v0  ;;  %398 = vmatprep.subr.bf16.mxu1 %v533_v0 }
  0x51   :  { %379 = vmatpush3.bf16.msra.mxu0 %v420_v11  ;;  %399 = vmatpush3.bf16.msra.mxu1 %v428_v16 }
  0x52   :  { %380 = vmatprep.subr.bf16.mxu0 %v533_v0  ;;  %400 = vmatprep.subr.bf16.mxu1 %v533_v0 }
  0x55   :  { %381 = vmatpush3.bf16.msra.mxu0 %v421_v13  ;;  %401 = vmatpush3.bf16.msra.mxu1 %v429_v17 }
  0x58   :  { %383 = vmatmul.mubr.bf16.vlgmr.msra.gmra.mrb[0].mxu0 %v68_v15 }
 0x12b   :  { %v174_v19 = vpop.f32.mrb[0].mxu0 }
 0x12c   :  { %v175_v20 = vadd.f32 %v329_v18, %v174_v19  ;;  %v384_v21 = vpop.f32.mrb[1].mxu0 }
 0x12d   :  { %v177_v22 = vpop.f32.mrb[2].mxu0 }
 0x12e   :  { %v180_v23 = vmax.f32 %v175_v20, 0.0  ;;  %v385_v24 = vpop.f32.mrb[3].mxu0 }
 0x130   :  { %v181_v25 = vpack.c.bf16 %v180_v23, %v180_v23 }
 0x132   :  { %403 = vmatmul.mubr.bf16.vlgmr.msra.gmra.mrb[0].mxu1 %v181_v25 }
 0x205   :  { %v287_v27 = vpop.f32.mrb[0].mxu1 }
 0x206   :  { %v288_v28 = vadd.f32 %v338_v26, %v287_v27  ;;  %v404_v29 = vpop.f32.mrb[1].mxu1 }
 0x207   :  { %v290_v30 = vpop.f32.mrb[2].mxu1 }
 0x208   :  { %v293_v32 = vmax.f32 %v288_v28, 0.0  ;;  %v405_v33 = vpop.f32.mrb[3].mxu1 }
 0x20a   :  { %v301_v34 = vmul.f32 %v347_v31, %v293_v32 }
 0x20c   :  { %302 = vadd.xlane.f32.xlu0 %v301_v34 }
 0x299   :  { %v303_v36 = vpop.xlane.xlu0 %302 }
 0x29a   :  { %v306_v37 = vadd.f32 %v305_v35, %v303_v36 }
 0x29c   :  { %v307_v38 = vsub.f32 0.0, %v306_v37 }
 0x29e   :  { %v308_v39 = vmul.f32 1.442695, %v307_v38 }
 0x2a0   :  { %430 = vpow2.f32 %v308_v39 }
 0x2aa   :  { %v431_v40 = vpop.eup %430 }
 0x2ab   :  { %v310_v41 = vadd.f32 1.0, %v431_v40 }
 0x2ad   :  { %432 = vrcp.f32 %v310_v41 }
 0x2b7   :  { %v433_v42 = vpop.eup %432 }
 0x2b8   :  { %312 = vst [vmem:[#allocation9] sm:$0xff] %v433_v42 }
 0x2b9   :  { %511 = shalt.err (!%p508_p0)
}
 0x2ba   :  { %s512_s22 = scalar_lea.hbm %s649_s7, 128 }
 0x2bb   :  { %p513_p1 = scmp.ne.s32.totalorder %s649_s7, %s512_s22  ;;  %p516_p2 = scmp.lt.u32.totalorder %s512_s22, %s649_s7 }
 0x2bd   :  { %p518_p3 = pnand %p516_p2, %p513_p1 }
 0x2bf   :  { %521 = shalt.err (!%p518_p3)
}
 0x2c0   :  { %322 = dma.vmem_to_hbm [thread:$0]  %s320_s20, 128, %s649_s7, [#allocation5]  }
 0x2c1   :  { %526 = dma.done.wait [#allocation5], 128  }
 0x2c2   :  { %527 = vsyncadd [#allocation5], 4294967168 }
 0x2c3   :  { %326 = vsyncpa [#allocation4], 1 }
 0x2c4   :  { %327 = vsyncpa [#allocation7], 1 }
 0x2c5   :  { %328 = vsyncpa [#allocation5], 1 }

</bundles_post_ra>
